<compile_context>
chip_gen: v7x
topology: tpu7x:2x2x1
jax: 0.10.0
libtpu: 0.0.40
codegen_flags: <defaults>
</compile_context>

<pallas_src>
import functools

import jax
import jax.numpy as jnp
from jax.experimental import pallas as pl
from jax.experimental.pallas import tpu as pltpu

BN_EPS = 1e-5


def _round_up(n, m):
    return ((n + m - 1) // m) * m


def _pad2(a, rows, cols):
    return jnp.pad(a, ((0, rows - a.shape[0]), (0, cols - a.shape[1])))


def _mlp_kernel(x_ref, w1_ref, gamma_ref, beta_ref, w2_ref, b2_ref, o_ref,
                acc_ref, *, inv_batch):
    k = pl.program_id(0)

    @pl.when(k == 0)
    def _():
        acc_ref[...] = jnp.zeros_like(acc_ref)

    # ---- Linear 1 (MXU, bf16 operands, f32 accumulation) ----
    # Pre-BN bias intentionally omitted: train-mode BN mean-subtraction cancels it.
    h = jnp.dot(x_ref[...], w1_ref[...], preferred_element_type=jnp.float32)

    # ---- BatchNorm1d (training-mode, biased stats), single fused reduction ----
    # Padded batch rows of x are zero -> contribute 0 to both sums; divide by the
    # real batch size so statistics match the unpadded batch exactly.
    s = jnp.sum(h, axis=0, keepdims=True)
    ss = jnp.sum(h * h, axis=0, keepdims=True)
    mean = s * inv_batch
    var = jnp.maximum(ss * inv_batch - mean * mean, 0.0)
    hn = (h - mean) * jax.lax.rsqrt(var + BN_EPS)
    hn = hn * gamma_ref[...] + beta_ref[...]

    # ---- ReLU (VPU, f32) ----
    hn = jnp.maximum(hn, 0.0)

    # ---- Linear 2 (MXU), accumulated across hidden tiles ----
    acc_ref[...] += jnp.dot(hn.astype(jnp.bfloat16), w2_ref[...],
                            preferred_element_type=jnp.float32)

    @pl.when(k == pl.num_programs(0) - 1)
    def _():
        o_ref[...] = acc_ref[...] + b2_ref[...]


def mlp_forward(x, w1, gamma, beta, w2, b2):
    B, D_in = x.shape
    H = w1.shape[1]
    D_out = w2.shape[1]

    # Lane/sublane-dense padded shapes.
    Bp = _round_up(B, 8)
    Dip = _round_up(D_in, 128)
    Hp = _round_up(H, 128)
    Dop = _round_up(D_out, 128)

    # Largest hidden tile (multiple of 128) dividing Hp, capped at 512 to stay
    # well inside the v7x 64-MiB physical / 32-MiB default scoped VMEM budget.
    th = 128
    for cand in (512, 256, 128):
        if Hp % cand == 0:
            th = cand
            break

    # Zero padding keeps semantics exact: padded hidden columns stay identically
    # zero through BN (beta pad = 0) and contribute nothing via zero W2 rows;
    # padded batch/output rows/cols are sliced off below.
    xp = _pad2(x, Bp, Dip).astype(jnp.bfloat16)
    w1p = _pad2(w1, Dip, Hp).astype(jnp.bfloat16)
    w2p = _pad2(w2, Hp, Dop).astype(jnp.bfloat16)
    gp = _pad2(gamma.reshape(1, -1), 1, Hp).astype(jnp.float32)
    btp = _pad2(beta.reshape(1, -1), 1, Hp).astype(jnp.float32)
    b2p = _pad2(b2.reshape(1, -1), 1, Dop).astype(jnp.float32)

    kernel = functools.partial(_mlp_kernel, inv_batch=1.0 / B)

    out = pl.pallas_call(
        kernel,
        out_shape=jax.ShapeDtypeStruct((Bp, Dop), jnp.float32),
        grid_spec=pltpu.PrefetchScalarGridSpec(
            num_scalar_prefetch=0,
            grid=(Hp // th,),
            in_specs=[
                pl.BlockSpec((Bp, Dip), lambda k: (0, 0)),   # x: VMEM-resident
                pl.BlockSpec((Dip, th), lambda k: (0, k)),   # W1 hidden tile
                pl.BlockSpec((1, th), lambda k: (0, k)),     # BN gamma tile
                pl.BlockSpec((1, th), lambda k: (0, k)),     # BN beta tile
                pl.BlockSpec((th, Dop), lambda k: (k, 0)),   # W2 hidden tile
                pl.BlockSpec((1, Dop), lambda k: (0, 0)),    # b2: VMEM-resident
            ],
            out_specs=pl.BlockSpec((Bp, Dop), lambda k: (0, 0)),  # accumulator-resident
            scratch_shapes=[pltpu.VMEM((Bp, Dop), jnp.float32)],
        ),
        compiler_params=pltpu.CompilerParams(
            # Hidden axis is a reduction into the resident output block.
            dimension_semantics=("arbitrary",),
        ),
    )(xp, w1p, gp, btp, w2p, b2p)

    return out[:B, :D_out]


def init_params(key, input_dim, hidden_dim, output_dim):
    """Parameter shapes of the PyTorch module (num_hidden_layers=1):
    Linear(in, hid), BatchNorm1d(hid), Linear(hid, out)."""
    k1, k2, k3, k4 = jax.random.split(key, 4)
    lim1 = 1.0 / jnp.sqrt(input_dim)
    lim2 = 1.0 / jnp.sqrt(hidden_dim)
    w1 = jax.random.uniform(k1, (input_dim, hidden_dim), jnp.float32, -lim1, lim1)
    b1 = jax.random.uniform(k2, (hidden_dim,), jnp.float32, -lim1, lim1)
    gamma = jnp.ones((hidden_dim,), jnp.float32)    # BatchNorm1d weight
    beta = jnp.zeros((hidden_dim,), jnp.float32)    # BatchNorm1d bias
    w2 = jax.random.uniform(k3, (hidden_dim, output_dim), jnp.float32, -lim2, lim2)
    b2 = jax.random.uniform(k4, (output_dim,), jnp.float32, -lim2, lim2)
    return w1, b1, gamma, beta, w2, b2


if __name__ == "__main__":
    key = jax.random.PRNGKey(0)
    kx, kp = jax.random.split(key)

    batch, input_dim, hidden_dim, output_dim = 8, 32, 64, 16
    x = jax.random.normal(kx, (batch, input_dim), jnp.float32)
    w1, b1, gamma, beta, w2, b2 = init_params(kp, input_dim, hidden_dim, output_dim)

    out = mlp_forward(x, w1, gamma, beta, w2, b2)
    jax.block_until_ready(out)

    # Pure-JAX f32 reference of the PyTorch forward (b1 INCLUDED here; the kernel
    # omits it because train-mode BN cancels it exactly).
    h = x @ w1 + b1
    mean = jnp.mean(h, axis=0, keepdims=True)
    var = jnp.mean((h - mean) ** 2, axis=0, keepdims=True)
    h = (h - mean) / jnp.sqrt(var + BN_EPS) * gamma + beta
    ref = jnp.maximum(h, 0.0) @ w2 + b2

    assert out.shape == (batch, output_dim)
    assert jnp.allclose(out, ref, atol=5e-2, rtol=5e-2), float(jnp.max(jnp.abs(out - ref)))

    print("KERNEL_OK")
</pallas_src>

<mosaic_0001>
module attributes {stable_mosaic.version = 11 : i64} {
  func.func @_mlp_kernel(%arg0: i32, %arg1: memref<8x128xbf16, #tpu.memory_space<vmem>>, %arg2: memref<128x128xbf16, #tpu.memory_space<vmem>>, %arg3: memref<1x128xf32, #tpu.memory_space<vmem>>, %arg4: memref<1x128xf32, #tpu.memory_space<vmem>>, %arg5: memref<128x128xbf16, #tpu.memory_space<vmem>>, %arg6: memref<1x128xf32, #tpu.memory_space<vmem>>, %arg7: memref<8x128xf32, #tpu.memory_space<vmem>>, %arg8: memref<8x128xf32, #tpu.memory_space<vmem>>) attributes {dimension_semantics = [#tpu.dimension_semantics<arbitrary>], iteration_bounds = array<i64: 1>, scalar_prefetch = 0 : i64, scratch_operands = 1 : i64, tpu.core_type = #tpu.core_type<tc>, window_params = [{pipeline_mode = #tpu.pipeline_mode<synchronous>, transform_indices = @transform_0, window_bounds = array<i64: 8, 128>}, {transform_indices = @transform_1, window_bounds = array<i64: 128, 128>}, {transform_indices = @transform_2, window_bounds = array<i64: 1, 128>}, {transform_indices = @transform_3, window_bounds = array<i64: 1, 128>}, {transform_indices = @transform_4, window_bounds = array<i64: 128, 128>}, {pipeline_mode = #tpu.pipeline_mode<synchronous>, transform_indices = @transform_5, window_bounds = array<i64: 1, 128>}, {pipeline_mode = #tpu.pipeline_mode<synchronous>, transform_indices = @transform_6, window_bounds = array<i64: 8, 128>}]} {
    %c0_i32 = arith.constant 0 : i32
    %0 = arith.cmpi eq, %arg0, %c0_i32 : i32
    %1 = arith.extui %0 : i1 to i32
    %c0_i32_0 = arith.constant 0 : i32
    %2 = arith.cmpi ne, %1, %c0_i32_0 : i32
    scf.if %2 {
      %cst_24 = arith.constant 0.000000e+00 : f32
      %43 = vector.broadcast %cst_24 : f32 to vector<8x128xf32>
      %c0_25 = arith.constant 0 : index
      %c0_26 = arith.constant 0 : index
      %44 = vector.load %arg8[%c0_25, %c0_26] : memref<8x128xf32, #tpu.memory_space<vmem>>, vector<8x128xf32>
      tpu.vector_store %arg8[%c0_25, %c0_26], %43 {strides = array<i32>} : memref<8x128xf32, #tpu.memory_space<vmem>>, vector<8x128xf32>,
    } else {
    }
    %c0 = arith.constant 0 : index
    %c0_1 = arith.constant 0 : index
    %3 = vector.load %arg1[%c0, %c0_1] : memref<8x128xbf16, #tpu.memory_space<vmem>>, vector<8x128xbf16>
    %c0_2 = arith.constant 0 : index
    %c0_3 = arith.constant 0 : index
    %4 = vector.load %arg2[%c0_2, %c0_3] : memref<128x128xbf16, #tpu.memory_space<vmem>>, vector<128x128xbf16>
    %cst = arith.constant dense<0.000000e+00> : vector<8x128xf32>
    %5 = tpu.matmul %3, %4, %cst {dimension_numbers = #tpu.dot_dimension_numbers<[1], [0], [0], [1], [0, 0, 1, 1], [], []>} : vector<8x128xbf16>, vector<128x128xbf16>, vector<8x128xf32> -> vector<8x128xf32>
    %cst_4 = arith.constant dense<0.000000e+00> : vector<128xf32>
    %6 = vector.multi_reduction <add>, %5, %cst_4 [0] : vector<8x128xf32> to vector<128xf32>
    %7 = vector.shape_cast %6 : vector<128xf32> to vector<1x128xf32>
    %8 = arith.mulf %5, %5 : vector<8x128xf32>
    %cst_5 = arith.constant dense<0.000000e+00> : vector<128xf32>
    %9 = vector.multi_reduction <add>, %8, %cst_5 [0] : vector<8x128xf32> to vector<128xf32>
    %10 = vector.shape_cast %9 : vector<128xf32> to vector<1x128xf32>
    %cst_6 = arith.constant 1.250000e-01 : f32
    %11 = vector.broadcast %cst_6 : f32 to vector<1x128xf32>
    %12 = arith.mulf %7, %11 : vector<1x128xf32>
    %cst_7 = arith.constant 1.250000e-01 : f32
    %13 = vector.broadcast %cst_7 : f32 to vector<1x128xf32>
    %14 = arith.mulf %10, %13 : vector<1x128xf32>
    %15 = arith.mulf %12, %12 : vector<1x128xf32>
    %16 = arith.subf %14, %15 : vector<1x128xf32>
    %cst_8 = arith.constant 0.000000e+00 : f32
    %17 = vector.broadcast %cst_8 : f32 to vector<1x128xf32>
    %18 = arith.maximumf %16, %17 : vector<1x128xf32>
    %19 = vector.broadcast %12 : vector<1x128xf32> to vector<8x128xf32>
    %20 = arith.subf %5, %19 : vector<8x128xf32>
    %cst_9 = arith.constant 9.99999974E-6 : f32
    %21 = vector.broadcast %cst_9 : f32 to vector<1x128xf32>
    %22 = arith.addf %18, %21 : vector<1x128xf32>
    %23 = math.rsqrt %22 : vector<1x128xf32>
    %24 = vector.broadcast %23 : vector<1x128xf32> to vector<8x128xf32>
    %25 = arith.mulf %20, %24 : vector<8x128xf32>
    %c0_10 = arith.constant 0 : index
    %c0_11 = arith.constant 0 : index
    %26 = vector.load %arg3[%c0_10, %c0_11] : memref<1x128xf32, #tpu.memory_space<vmem>>, vector<1x128xf32>
    %27 = vector.broadcast %26 : vector<1x128xf32> to vector<8x128xf32>
    %28 = arith.mulf %25, %27 : vector<8x128xf32>
    %c0_12 = arith.constant 0 : index
    %c0_13 = arith.constant 0 : index
    %29 = vector.load %arg4[%c0_12, %c0_13] : memref<1x128xf32, #tpu.memory_space<vmem>>, vector<1x128xf32>
    %30 = vector.broadcast %29 : vector<1x128xf32> to vector<8x128xf32>
    %31 = arith.addf %28, %30 : vector<8x128xf32>
    %cst_14 = arith.constant 0.000000e+00 : f32
    %32 = vector.broadcast %cst_14 : f32 to vector<8x128xf32>
    %33 = arith.maximumf %31, %32 : vector<8x128xf32>
    %c0_15 = arith.constant 0 : index
    %c0_16 = arith.constant 0 : index
    %34 = vector.load %arg8[%c0_15, %c0_16] : memref<8x128xf32, #tpu.memory_space<vmem>>, vector<8x128xf32>
    %35 = arith.truncf %33 : vector<8x128xf32> to vector<8x128xbf16>
    %c0_17 = arith.constant 0 : index
    %c0_18 = arith.constant 0 : index
    %36 = vector.load %arg5[%c0_17, %c0_18] : memref<128x128xbf16, #tpu.memory_space<vmem>>, vector<128x128xbf16>
    %cst_19 = arith.constant dense<0.000000e+00> : vector<8x128xf32>
    %37 = tpu.matmul %35, %36, %cst_19 {dimension_numbers = #tpu.dot_dimension_numbers<[1], [0], [0], [1], [0, 0, 1, 1], [], []>} : vector<8x128xbf16>, vector<128x128xbf16>, vector<8x128xf32> -> vector<8x128xf32>
    %38 = arith.addf %34, %37 : vector<8x128xf32>
    %c0_20 = arith.constant 0 : index
    %c0_21 = arith.constant 0 : index
    %39 = vector.load %arg8[%c0_20, %c0_21] : memref<8x128xf32, #tpu.memory_space<vmem>>, vector<8x128xf32>
    tpu.vector_store %arg8[%c0_20, %c0_21], %38 {strides = array<i32>} : memref<8x128xf32, #tpu.memory_space<vmem>>, vector<8x128xf32>,
    %c0_i32_22 = arith.constant 0 : i32
    %40 = arith.cmpi eq, %arg0, %c0_i32_22 : i32
    %41 = arith.extui %40 : i1 to i32
    %c0_i32_23 = arith.constant 0 : i32
    %42 = arith.cmpi ne, %41, %c0_i32_23 : i32
    scf.if %42 {
      %c0_24 = arith.constant 0 : index
      %c0_25 = arith.constant 0 : index
      %43 = vector.load %arg8[%c0_24, %c0_25] : memref<8x128xf32, #tpu.memory_space<vmem>>, vector<8x128xf32>
      %c0_26 = arith.constant 0 : index
      %c0_27 = arith.constant 0 : index
      %44 = vector.load %arg6[%c0_26, %c0_27] : memref<1x128xf32, #tpu.memory_space<vmem>>, vector<1x128xf32>
      %45 = vector.broadcast %44 : vector<1x128xf32> to vector<8x128xf32>
      %46 = arith.addf %43, %45 : vector<8x128xf32>
      %c0_28 = arith.constant 0 : index
      %c0_29 = arith.constant 0 : index
      %47 = vector.load %arg7[%c0_28, %c0_29] : memref<8x128xf32, #tpu.memory_space<vmem>>, vector<8x128xf32>
      tpu.vector_store %arg7[%c0_28, %c0_29], %46 {strides = array<i32>} : memref<8x128xf32, #tpu.memory_space<vmem>>, vector<8x128xf32>,
    } else {
    }
    return
  }
  func.func @transform_0(%arg0: i32) -> (i32, i32) {
    %c0_i32 = arith.constant 0 : i32
    %c0_i32_0 = arith.constant 0 : i32
    %c0_i32_1 = arith.constant 0 : i32
    return %c0_i32, %c0_i32_0 : i32, i32
  }
  func.func @transform_1(%arg0: i32) -> (i32, i32) {
    %c0_i32 = arith.constant 0 : i32
    %c0_i32_0 = arith.constant 0 : i32
    return %c0_i32, %arg0 : i32, i32
  }
  func.func @transform_2(%arg0: i32) -> (i32, i32) {
    %c0_i32 = arith.constant 0 : i32
    %c0_i32_0 = arith.constant 0 : i32
    return %c0_i32, %arg0 : i32, i32
  }
  func.func @transform_3(%arg0: i32) -> (i32, i32) {
    %c0_i32 = arith.constant 0 : i32
    %c0_i32_0 = arith.constant 0 : i32
    return %c0_i32, %arg0 : i32, i32
  }
  func.func @transform_4(%arg0: i32) -> (i32, i32) {
    %c0_i32 = arith.constant 0 : i32
    %c0_i32_0 = arith.constant 0 : i32
    return %arg0, %c0_i32 : i32, i32
  }
  func.func @transform_5(%arg0: i32) -> (i32, i32) {
    %c0_i32 = arith.constant 0 : i32
    %c0_i32_0 = arith.constant 0 : i32
    %c0_i32_1 = arith.constant 0 : i32
    return %c0_i32, %c0_i32_0 : i32, i32
  }
  func.func @transform_6(%arg0: i32) -> (i32, i32) {
    %c0_i32 = arith.constant 0 : i32
    %c0_i32_0 = arith.constant 0 : i32
    %c0_i32_1 = arith.constant 0 : i32
    return %c0_i32, %c0_i32_0 : i32, i32
  }
}

</mosaic_0001>

<bundles_post_ra>
// kernel: tpu_custom_call.1
= control target key start
LH: loop header
LB: loop body
LE: loop exit
PB: predicated region body
PF: predicated region fallthrough
CT: control target
= control target key end

     0   :  { %11 = vsyncpa [#allocation4], 0  ;;  %s653_s0 = inlined_call_operand.hbm [shape: bf16[8,128], index: 0, kind: input, shape index: {}]   ;;  %s654_s1 = inlined_call_operand.hbm [shape: bf16[128,128], index: 1, kind: input, shape index: {}]   ;;  %s655_s2 = inlined_call_operand.vmem [shape: f32[1,128], index: 2, kind: input, shape index: {}]   ;;  %s656_s3 = inlined_call_operand.vmem [shape: f32[1,128], index: 3, kind: input, shape index: {}]   ;;  %s657_s4 = inlined_call_operand.hbm [shape: bf16[128,128], index: 4, kind: input, shape index: {}]   ;;  %s658_s5 = inlined_call_operand.vmem [shape: f32[1,128], index: 5, kind: input, shape index: {}]   ;;  %s659_s6 = inlined_call_operand.hbm [shape: f32[8,128], index: 6, kind: output, shape index: {}]  }
   0x1   :  { %12 = vsyncpa [#allocation7], 0 }
   0x2   :  { %13 = vsyncpa [#allocation5], 0  ;;  %s547_s21 = smov [#allocation6]   ;;  %s453_s25 = scalar_lea.hbm %s654_s1, 1024 }
   0x3   :  { %s29_s22 = sshll.u32 %s547_s21, 4  ;;  %p454_p0 = scmp.ne.s32.totalorder %s654_s1, %s453_s25  ;;  %s30_s22 = int_to_ptr.vmem [resolvable:$true] %s29_s22 }
   0x4   :  { %p457_p1 = scmp.lt.u32.totalorder %s453_s25, %s654_s1 }
   0x6   :  { %p459_p2 = pnand %p457_p1, %p454_p0 }
   0x8   :  { %462 = shalt.err (!%p459_p2)
}
   0x9   :  { %s463_s30 = scalar_lea.vmem %s30_s22, 1024  ;;  %p468_p4 = scmp.lt.s32.totalorder %s30_s22, %s30_s22 }
   0xa   :  { %p464_p3 = scmp.ne.s32.totalorder %s30_s22, %s463_s30  ;;  %p469_p5 = scmp.lt.s32.totalorder %s463_s30, %s463_s30 }
   0xc   :  { %p470_p6 = por %p469_p5, %p468_p4 }
   0xe   :  { %p471_p7 = pnand %p470_p6, %p464_p3 }
  0x10   :  { %474 = shalt.err (!%p471_p7)
}
  0x11   :  { %s548_s7 = smov 64   ;;  %s549_s8 = smov 4  }
  0x12   :  { %35 = dma.hbm_to_vmem [thread:$0]  %s654_s1, 1024, %s30_s22, [#allocation7], %s548_s7, %s548_s7, %s549_s8  }
  0x13   :  { %s550_s11 = smov [#allocation3]   ;;  %s551_s13 = smov [#allocation8]  }
  0x14   :  { %s20_s12 = sshll.u32 %s550_s11, 4  ;;  %s45_s14 = sshll.u32 %s551_s13, 4  ;;  %s21_s12 = int_to_ptr.vmem [resolvable:$true] %s20_s12  ;;  %s46_s14 = int_to_ptr.vmem [resolvable:$true] %s45_s14 }
  0x15   :  { %s475_s17 = scalar_lea.hbm %s653_s0, 64 }
  0x16   :  { %p476_p8 = scmp.ne.s32.totalorder %s653_s0, %s475_s17  ;;  %p479_p9 = scmp.lt.u32.totalorder %s475_s17, %s653_s0 }
  0x18   :  { %p481_p10 = pnand %p479_p9, %p476_p8 }
  0x1a   :  { %484 = shalt.err (!%p481_p10)
}
  0x1b   :  { %s485_s1 = scalar_lea.vmem %s21_s12, 64  ;;  %p490_p12 = scmp.lt.s32.totalorder %s21_s12, %s21_s12 }
  0x1c   :  { %p486_p11 = scmp.ne.s32.totalorder %s21_s12, %s485_s1  ;;  %p491_p13 = scmp.lt.s32.totalorder %s485_s1, %s485_s1 }
  0x1e   :  { %p492_p0 = por %p491_p13, %p490_p12 }
  0x20   :  { %p493_p1 = pnand %p492_p0, %p486_p11 }
  0x22   :  { %496 = shalt.err (!%p493_p1)
}
  0x23   :  { %23 = dma.hbm_to_vmem [thread:$0]  %s653_s0, 64, %s21_s12, [#allocation4]  }
  0x24   :  { %s497_s26 = scalar_lea.hbm %s657_s4, 1024 }
  0x25   :  { %p498_p2 = scmp.ne.s32.totalorder %s657_s4, %s497_s26  ;;  %p501_p3 = scmp.lt.u32.totalorder %s497_s26, %s657_s4 }
  0x27   :  { %p503_p4 = pnand %p501_p3, %p498_p2 }
  0x29   :  { %506 = shalt.err (!%p503_p4)
}
  0x2a   :  { %s507_s9 = scalar_lea.vmem %s46_s14, 1024  ;;  %p512_p6 = scmp.lt.s32.totalorder %s46_s14, %s46_s14 }
  0x2b   :  { %p508_p5 = scmp.ne.s32.totalorder %s46_s14, %s507_s9  ;;  %p513_p7 = scmp.lt.s32.totalorder %s507_s9, %s507_s9 }
  0x2d   :  { %p514_p8 = por %p513_p7, %p512_p6 }
  0x2f   :  { %p515_p9 = pnand %p514_p8, %p508_p5 }
  0x31   :  { %518 = shalt.err (!%p515_p9)
}
  0x32   :  { %51 = dma.hbm_to_vmem [thread:$0]  %s657_s4, 1024, %s46_s14, [#allocation7], %s548_s7, %s548_s7, %s549_s8  }
  0x33   :  { %541 = dma.done.wait [#allocation4], 64  }
  0x34   :  { %542 = vsyncadd [#allocation4], 4294967232 }
  0x35   :  { %543 = dma.done.wait [#allocation7], 2048  }
  0x36   :  { %544 = vsyncadd [#allocation7], 4294965248  ;;  %v552_v0 = vmov 0.0   ;;  %vm553_vm0 = vmmov 0   ;;  %v435_v1 = vld [vmem:[#allocation6] sm:$0xff]   ;;  %v436_v2 = vld [vmem:[#allocation6 + $0x8] sm:$0xff]  }
  0x37   :  { %387 = vmatprep.subr.bf16.mxu0 %v552_v0  ;;  %403 = vmatprep.mubr.msk.bf16.mxu0 %vm553_vm0, %v552_v0  ;;  %v437_v3 = vld [vmem:[#allocation6 + $0x10] sm:$0xff]   ;;  %v438_v4 = vld [vmem:[#allocation6 + $0x18] sm:$0xff]   ;;  %v439_v5 = vld [vmem:[#allocation6 + $0x20] sm:$0xff]   ;;  %s554_s14 = smov [#allocation9]  }
  0x38   :  { %407 = vmatprep.subr.bf16.mxu1 %v552_v0  ;;  %423 = vmatprep.mubr.msk.bf16.mxu1 %vm553_vm0, %v552_v0  ;;  %v440_v6 = vld [vmem:[#allocation6 + $0x28] sm:$0xff]   ;;  %v441_v7 = vld [vmem:[#allocation6 + $0x30] sm:$0xff]   ;;  %v442_v8 = vld [vmem:[#allocation6 + $0x38] sm:$0xff]   ;;  %s340_s15 = sshll.u32 %s554_s14, 4  ;;  %s341_s15 = int_to_ptr.vmem [resolvable:$true] %s340_s15 }
  0x39   :  { %388 = vmatpush3.bf16.msra.mxu0 %v435_v1  ;;  %v69_v9 = vld [vmem:[#allocation3] sm:$0xf]  ;;  %v443_v10 = vld [vmem:[#allocation8] sm:$0xff]   ;;  %v444_v11 = vld [vmem:[#allocation8 + $0x8] sm:$0xff]   ;;  %p524_p11 = scmp.lt.s32.totalorder %s341_s15, %s341_s15 }
  0x3a   :  { %389 = vmatprep.subr.bf16.mxu0 %v552_v0  ;;  %408 = vmatpush3.bf16.msra.mxu1 %v443_v10  ;;  %v445_v12 = vld [vmem:[#allocation8 + $0x10] sm:$0xff]   ;;  %v446_v13 = vld [vmem:[#allocation8 + $0x18] sm:$0xff]   ;;  %v447_v14 = vld [vmem:[#allocation8 + $0x20] sm:$0xff]  }
  0x3b   :  { %409 = vmatprep.subr.bf16.mxu1 %v552_v0  ;;  %v448_v15 = vld [vmem:[#allocation8 + $0x28] sm:$0xff]   ;;  %v449_v16 = vld [vmem:[#allocation8 + $0x30] sm:$0xff]   ;;  %v450_v17 = vld [vmem:[#allocation8 + $0x38] sm:$0xff]  }
  0x3c   :  { %v358_v43 = vld [vmem:[%s655_s2] ss:$0 sm:$0xff]  ;;  %s519_s2 = scalar_lea.vmem %s341_s15, 128 }
  0x3d   :  { %390 = vmatpush3.bf16.msra.mxu0 %v436_v2  ;;  %v359_v45 = vld [vmem:[%s656_s3] ss:$0 sm:$0xff]  ;;  %p520_p10 = scmp.ne.s32.totalorder %s341_s15, %s519_s2  ;;  %p525_p12 = scmp.lt.s32.totalorder %s519_s2, %s519_s2 }
  0x3e   :  { %391 = vmatprep.subr.bf16.mxu0 %v552_v0  ;;  %410 = vmatpush3.bf16.msra.mxu1 %v444_v11  ;;  %v368_v50 = vld [vmem:[%s658_s5] ss:$0 sm:$0xff] }
  0x3f   :  { %411 = vmatprep.subr.bf16.mxu1 %v552_v0  ;;  %p526_p13 = por %p525_p12, %p524_p11 }
  0x41   :  { %392 = vmatpush3.bf16.msra.mxu0 %v437_v3  ;;  %p527_p0 = pnand %p526_p13, %p520_p10 }
  0x42   :  { %393 = vmatprep.subr.bf16.mxu0 %v552_v0  ;;  %412 = vmatpush3.bf16.msra.mxu1 %v445_v12 }
  0x43   :  { %413 = vmatprep.subr.bf16.mxu1 %v552_v0 }
  0x45   :  { %394 = vmatpush3.bf16.msra.mxu0 %v438_v4 }
  0x46   :  { %395 = vmatprep.subr.bf16.mxu0 %v552_v0  ;;  %414 = vmatpush3.bf16.msra.mxu1 %v446_v13 }
  0x47   :  { %415 = vmatprep.subr.bf16.mxu1 %v552_v0 }
  0x49   :  { %396 = vmatpush3.bf16.msra.mxu0 %v439_v5 }
  0x4a   :  { %397 = vmatprep.subr.bf16.mxu0 %v552_v0  ;;  %416 = vmatpush3.bf16.msra.mxu1 %v447_v14 }
  0x4b   :  { %417 = vmatprep.subr.bf16.mxu1 %v552_v0 }
  0x4d   :  { %398 = vmatpush3.bf16.msra.mxu0 %v440_v6 }
  0x4e   :  { %399 = vmatprep.subr.bf16.mxu0 %v552_v0  ;;  %418 = vmatpush3.bf16.msra.mxu1 %v448_v15 }
  0x4f   :  { %419 = vmatprep.subr.bf16.mxu1 %v552_v0 }
  0x51   :  { %400 = vmatpush3.bf16.msra.mxu0 %v441_v7 }
  0x52   :  { %401 = vmatprep.subr.bf16.mxu0 %v552_v0  ;;  %420 = vmatpush3.bf16.msra.mxu1 %v449_v16 }
  0x53   :  { %421 = vmatprep.subr.bf16.mxu1 %v552_v0 }
  0x55   :  { %402 = vmatpush3.bf16.msra.mxu0 %v442_v8 }
  0x56   :  { %422 = vmatpush3.bf16.msra.mxu1 %v450_v17 }
  0x58   :  { %404 = vmatmul.mubr.bf16.vlgmr.msra.gmra.mrb[0].mxu0 %v69_v9 }
 0x12b   :  { %v168_v18 = vpop.f32.mrb[0].mxu0 }
 0x12c   :  { %v174_v19 = vrot.slane %v168_v18, 4  ;;  %v180_v20 = vmul.f32 %v168_v18, %v168_v18  ;;  %v405_v21 = vpop.f32.mrb[1].mxu0 }
 0x12d   :  { %v171_v22 = vpop.f32.mrb[2].mxu0 }
 0x12e   :  { %v175_v23 = vadd.f32 %v174_v19, %v168_v18  ;;  %v181_v24 = vrot.slane %v180_v20, 4  ;;  %v406_v25 = vpop.f32.mrb[3].mxu0 }
 0x130   :  { %v176_v26 = vrot.slane %v175_v23, 2  ;;  %v182_v27 = vadd.f32 %v181_v24, %v180_v20 }
 0x132   :  { %v177_v28 = vadd.f32 %v176_v26, %v175_v23  ;;  %v183_v29 = vrot.slane %v182_v27, 2 }
 0x134   :  { %v178_v30 = vrot.slane %v177_v28, 1  ;;  %v184_v31 = vadd.f32 %v183_v29, %v182_v27 }
 0x136   :  { %v179_v32 = vadd.f32 %v178_v30, %v177_v28  ;;  %v185_v33 = vrot.slane %v184_v31, 1 }
 0x138   :  { %v186_v34 = vadd.f32 %v185_v33, %v184_v31  ;;  %v187_v35 = vmul.f32 0.125, %v179_v32 }
 0x13a   :  { %v188_v36 = vmul.f32 0.125, %v186_v34  ;;  %v189_v37 = vmul.f32 %v187_v35, %v187_v35  ;;  %v192_v41 = vsub.f32 %v168_v18, %v187_v35 }
 0x13c   :  { %v190_v38 = vsub.f32 %v188_v36, %v189_v37 }
 0x13e   :  { %v191_v39 = vmax.f32 %v190_v38, 0.0 }
 0x140   :  { %v193_v40 = vadd.f32 1e-05, %v191_v39 }
 0x142   :  { %451 = vrsqrt.f32 %v193_v40 }
 0x14c   :  { %v452_v42 = vpop.eup %451 }
 0x14d   :  { %v195_v44 = vmul.f32 %v452_v42, %v192_v41 }
 0x14f   :  { %v203_v46 = vmul.f32 %v358_v43, %v195_v44 }
 0x151   :  { %v211_v47 = vadd.f32 %v359_v45, %v203_v46 }
 0x153   :  { %v212_v48 = vmax.f32 %v211_v47, 0.0 }
 0x155   :  { %v214_v49 = vpack.c.bf16 %v212_v48, %v212_v48 }
 0x157   :  { %424 = vmatmul.mubr.bf16.vlgmr.msra.gmra.mrb[0].mxu1 %v214_v49 }
 0x22a   :  { %v313_v51 = vpop.f32.mrb[0].mxu1 }
 0x22b   :  { %v332_v52 = vadd.f32 %v368_v50, %v313_v51  ;;  %v425_v53 = vpop.f32.mrb[1].mxu1 }
 0x22c   :  { %v316_v54 = vpop.f32.mrb[2].mxu1 }
 0x22d   :  { %333 = vst [vmem:[#allocation9] sm:$0xff] %v332_v52  ;;  %v426_v55 = vpop.f32.mrb[3].mxu1 }
 0x22e   :  { %530 = shalt.err (!%p527_p0)
}
 0x22f   :  { %s531_s5 = scalar_lea.hbm %s659_s6, 128 }
 0x230   :  { %p532_p1 = scmp.ne.s32.totalorder %s659_s6, %s531_s5  ;;  %p535_p2 = scmp.lt.u32.totalorder %s531_s5, %s659_s6 }
 0x232   :  { %p537_p3 = pnand %p535_p2, %p532_p1 }
 0x234   :  { %540 = shalt.err (!%p537_p3)
}
 0x235   :  { %343 = dma.vmem_to_hbm [thread:$0]  %s341_s15, 128, %s659_s6, [#allocation5]  }
 0x236   :  { %545 = dma.done.wait [#allocation5], 128  }
 0x237   :  { %546 = vsyncadd [#allocation5], 4294967168 }
 0x238   :  { %347 = vsyncpa [#allocation4], 1 }
 0x239   :  { %348 = vsyncpa [#allocation7], 1 }
 0x23a   :  { %349 = vsyncpa [#allocation5], 1 }

</bundles_post_ra>
